<compile_context>
chip_gen: v6e
topology: v6e:2x2x1
jax: 0.10.0
libtpu: 0.0.40
codegen_flags: <defaults>
</compile_context>

<pallas_src>
import functools

import jax
import jax.numpy as jnp
from jax import lax
from jax.experimental import pallas as pl
from jax.experimental.pallas import tpu as pltpu


# ----------------------------- tiling helpers -----------------------------

def _round_up(x, m):
    return ((x + m - 1) // m) * m


def _sublane_unit(dtype):
    # Min sublane tile: 8 rows for 32-bit, 16 for 16-bit, 32 for 8-bit dtypes.
    return max(8, 32 // jnp.dtype(dtype).itemsize)


def _lane_unit(dim):
    # Prefer 256-multiples (v6e/v7x MXU is 2x256x256); 128 suffices for tiny dims.
    return 256 if dim > 128 else 128


def _tile_and_pad(dim, unit, cap):
    """Return (tile, padded_extent).  Pads `dim` UP to a tile multiple instead
    of shrinking the tile, so large dims always use full-size tiles."""
    padded = _round_up(max(dim, 1), unit)
    tile = min(cap, padded)
    padded = _round_up(padded, tile)
    return tile, padded


# -------------------------------- kernels ---------------------------------

def _linear_kernel_f32out(x_ref, w_ref, o_ref):
    # x_ref: (tm, tk), w_ref: (tk, tn) [pre-transposed weight], o_ref: (tm, tn) f32.
    # Output block is resident across the K grid axis -> accumulate in place,
    # no scratch and no extra full-tile store (vst slot is the scarcest).
    @pl.when(pl.program_id(2) == 0)
    def _():
        o_ref[...] = jnp.zeros_like(o_ref)

    o_ref[...] += jnp.dot(
        x_ref[...], w_ref[...], preferred_element_type=jnp.float32
    )


def _linear_kernel_acc(x_ref, w_ref, o_ref, acc_ref):
    # Same as above but stages through an f32 VMEM accumulator for narrow
    # output dtypes (bf16 etc.), casting once on the final K step.
    @pl.when(pl.program_id(2) == 0)
    def _():
        acc_ref[...] = jnp.zeros_like(acc_ref)

    acc_ref[...] += jnp.dot(
        x_ref[...], w_ref[...], preferred_element_type=jnp.float32
    )

    @pl.when(pl.program_id(2) == pl.num_programs(2) - 1)
    def _():
        o_ref[...] = acc_ref[...].astype(o_ref.dtype)


# ------------------------------- wrappers ----------------------------------

def prepare_weight(w, *, tn_max=1024, tk_max=1024):
    """One-time weight preparation (do NOT call per forward pass).

    w: (out_features, in_features)  -- PyTorch nn.Linear layout.
    Returns wp: (Kp, Np) zero-padded and transposed so the kernel's MXU
    contraction is a straight x_tile @ w_tile (no per-step XLU transposes).
    Use the same tn_max / tk_max here and in linear_forward.
    """
    N, K = w.shape
    _, Np = _tile_and_pad(N, _lane_unit(N), tn_max)
    _, Kp = _tile_and_pad(K, _lane_unit(K), tk_max)
    wp = jnp.zeros((Kp, Np), dtype=w.dtype).at[:K, :N].set(w.T)
    return wp


@functools.partial(
    jax.jit, static_argnames=("out_features", "tm_max", "tn_max", "tk_max")
)
def linear_forward(x, w_prepared, out_features, *, tm_max=512, tn_max=1024,
                   tk_max=1024):
    """y = x @ w.T with x: (B, in_features) and w_prepared from prepare_weight().
    Returns (B, out_features) in x.dtype."""
    B, K = x.shape
    Kp, Np = w_prepared.shape
    out_dtype = x.dtype

    # --- tile selection -----------------------------------------------------
    sub = _sublane_unit(x.dtype)
    tm, Mp = _tile_and_pad(B, sub, _round_up(tm_max, sub))   # tm == Mp for small B
    tn = Np if Np <= tn_max else tn_max
    tk = Kp if Kp <= tk_max else tk_max
    assert Np % tn == 0 and Kp % tk == 0, "use matching caps in prepare_weight"

    # Only the (small) activation is padded per call; weight was padded once.
    xp = x if (Mp == B and Kp == K) else jnp.pad(x, ((0, Mp - B), (0, Kp - K)))

    grid = (Mp // tm, Np // tn, Kp // tk)

    # --- cost / VMEM bookkeeping ---------------------------------------------
    x_isz = jnp.dtype(x.dtype).itemsize
    w_isz = jnp.dtype(w_prepared.dtype).itemsize
    o_isz = jnp.dtype(out_dtype).itemsize
    cost = pl.CostEstimate(
        flops=2 * Mp * Kp * Np,
        transcendentals=0,
        bytes_accessed=(Mp * Kp * x_isz) * (Np // tn)     # x re-read per N block
        + (Kp * Np * w_isz) * (Mp // tm)                  # w re-read per M block
        + Mp * Np * o_isz,                                # y written once
    )

    direct = out_dtype == jnp.float32
    kernel = _linear_kernel_f32out if direct else _linear_kernel_acc
    scratch = [] if direct else [pltpu.VMEM((tm, tn), jnp.float32)]

    # Double-buffered x/w/out (+ acc) working set; set the scoped-VMEM limit
    # explicitly (v5e default is only 16 MiB), capped below v7x's 64 MiB.
    ws_bytes = (2 * tm * tk * x_isz + 2 * tk * tn * w_isz
                + 2 * tm * tn * o_isz + (0 if direct else tm * tn * 4))
    vmem_limit = int(min(max(2 * ws_bytes, 32 * 1024 * 1024), 60 * 1024 * 1024))

    yp = pl.pallas_call(
        kernel,
        out_shape=jax.ShapeDtypeStruct((Mp, Np), out_dtype),
        grid_spec=pltpu.PrefetchScalarGridSpec(
            num_scalar_prefetch=0,
            grid=grid,
            in_specs=[
                pl.BlockSpec((tm, tk), lambda i, j, k: (i, k)),  # x tile
                pl.BlockSpec((tk, tn), lambda i, j, k: (k, j)),  # w tile (K, N)
            ],
            out_specs=pl.BlockSpec((tm, tn), lambda i, j, k: (i, j)),
            scratch_shapes=scratch,
        ),
        compiler_params=pltpu.CompilerParams(
            dimension_semantics=("parallel", "parallel", "arbitrary"),
            vmem_limit_bytes=vmem_limit,
        ),
        cost_estimate=cost,
    )(xp, w_prepared)

    return yp[:B, :out_features]


def linear_apply(x, w):
    """Convenience one-shot path (weight prep per call). Prefer prepare_weight()
    + linear_forward() when the weight is reused across calls."""
    return linear_forward(x, prepare_weight(w), out_features=w.shape[0])


# --------------------------------- test ------------------------------------

if __name__ == "__main__":
    key = jax.random.PRNGKey(0)
    k_x, k_w, k_x2, k_w2, k_x3, k_w3 = jax.random.split(key, 6)

    # --- Small shape matching the module's default (out_features=1) ---
    batch, in_features, out_features = 8, 32, 1
    x = jax.random.normal(k_x, (batch, in_features), dtype=jnp.float32)
    w = jax.random.normal(k_w, (out_features, in_features), dtype=jnp.float32) * 0.1

    wp = prepare_weight(w)                       # one-time weight prep
    y = linear_forward(x, wp, out_features=out_features)
    jax.block_until_ready(y)

    y_ref = x @ w.T
    assert y.shape == (batch, out_features)
    assert jnp.allclose(y, y_ref, atol=1e-5, rtol=1e-5)

    # --- Larger f32 shape: exercises padding to 256-multiples + direct-acc path ---
    B2, K2, N2 = 256, 512, 384
    x2 = jax.random.normal(k_x2, (B2, K2), dtype=jnp.float32)
    w2 = jax.random.normal(k_w2, (N2, K2), dtype=jnp.float32) * 0.05

    wp2 = prepare_weight(w2)
    y2 = linear_forward(x2, wp2, out_features=N2)
    jax.block_until_ready(y2)

    y2_ref = jnp.einsum("mk,nk->mn", x2, w2, precision=lax.Precision.HIGHEST)
    assert y2.shape == (B2, N2)
    assert jnp.allclose(y2, y2_ref, atol=5e-3, rtol=5e-3)

    # --- bf16 operands: exercises the f32-scratch kernel + 16-row sublane unit ---
    B3, K3, N3 = 64, 256, 256
    x3 = jax.random.normal(k_x3, (B3, K3), dtype=jnp.float32).astype(jnp.bfloat16)
    w3 = (jax.random.normal(k_w3, (N3, K3), dtype=jnp.float32) * 0.05).astype(
        jnp.bfloat16
    )

    wp3 = prepare_weight(w3)
    y3 = linear_forward(x3, wp3, out_features=N3)
    jax.block_until_ready(y3)

    y3_ref = jnp.dot(x3.astype(jnp.float32), w3.T.astype(jnp.float32))
    assert y3.shape == (B3, N3)
    assert jnp.allclose(y3.astype(jnp.float32), y3_ref, atol=2e-2, rtol=2e-2)

    print("KERNEL_OK")
</pallas_src>

<mosaic_0001>
module attributes {stable_mosaic.version = 11 : i64} {
  func.func @_linear_kernel_f32out(%arg0: i32, %arg1: i32, %arg2: i32, %arg3: memref<8x128xf32, #tpu.memory_space<vmem>>, %arg4: memref<128x128xf32, #tpu.memory_space<vmem>>, %arg5: memref<8x128xf32, #tpu.memory_space<vmem>>) attributes {dimension_semantics = [#tpu.dimension_semantics<parallel>, #tpu.dimension_semantics<parallel>, #tpu.dimension_semantics<arbitrary>], iteration_bounds = array<i64: 1, 1, 1>, scalar_prefetch = 0 : i64, scratch_operands = 0 : i64, tpu.core_type = #tpu.core_type<tc>, window_params = [{transform_indices = @transform_0, window_bounds = array<i64: 8, 128>}, {transform_indices = @transform_1, window_bounds = array<i64: 128, 128>}, {transform_indices = @transform_2, window_bounds = array<i64: 8, 128>}]} {
    %c0_i32 = arith.constant 0 : i32
    %0 = arith.cmpi eq, %arg2, %c0_i32 : i32
    %1 = arith.extui %0 : i1 to i32
    %c0_i32_0 = arith.constant 0 : i32
    %2 = arith.cmpi ne, %1, %c0_i32_0 : i32
    scf.if %2 {
      %cst_8 = arith.constant 0.000000e+00 : f32
      %9 = vector.broadcast %cst_8 : f32 to vector<8x128xf32>
      %c0_9 = arith.constant 0 : index
      %c0_10 = arith.constant 0 : index
      %10 = vector.load %arg5[%c0_9, %c0_10] : memref<8x128xf32, #tpu.memory_space<vmem>>, vector<8x128xf32>
      tpu.vector_store %arg5[%c0_9, %c0_10], %9 {strides = array<i32>} : memref<8x128xf32, #tpu.memory_space<vmem>>, vector<8x128xf32>,
    } else {
    }
    %c0 = arith.constant 0 : index
    %c0_1 = arith.constant 0 : index
    %3 = vector.load %arg5[%c0, %c0_1] : memref<8x128xf32, #tpu.memory_space<vmem>>, vector<8x128xf32>
    %c0_2 = arith.constant 0 : index
    %c0_3 = arith.constant 0 : index
    %4 = vector.load %arg3[%c0_2, %c0_3] : memref<8x128xf32, #tpu.memory_space<vmem>>, vector<8x128xf32>
    %c0_4 = arith.constant 0 : index
    %c0_5 = arith.constant 0 : index
    %5 = vector.load %arg4[%c0_4, %c0_5] : memref<128x128xf32, #tpu.memory_space<vmem>>, vector<128x128xf32>
    %cst = arith.constant dense<0.000000e+00> : vector<8x128xf32>
    %6 = tpu.matmul %4, %5, %cst {dimension_numbers = #tpu.dot_dimension_numbers<[1], [0], [0], [1], [0, 0, 1, 1], [], []>} : vector<8x128xf32>, vector<128x128xf32>, vector<8x128xf32> -> vector<8x128xf32>
    %7 = arith.addf %3, %6 : vector<8x128xf32>
    %c0_6 = arith.constant 0 : index
    %c0_7 = arith.constant 0 : index
    %8 = vector.load %arg5[%c0_6, %c0_7] : memref<8x128xf32, #tpu.memory_space<vmem>>, vector<8x128xf32>
    tpu.vector_store %arg5[%c0_6, %c0_7], %7 {strides = array<i32>} : memref<8x128xf32, #tpu.memory_space<vmem>>, vector<8x128xf32>,
    return
  }
  func.func @transform_0(%arg0: i32, %arg1: i32, %arg2: i32) -> (i32, i32) {
    %c0_i32 = arith.constant 0 : i32
    return %arg0, %arg2 : i32, i32
  }
  func.func @transform_1(%arg0: i32, %arg1: i32, %arg2: i32) -> (i32, i32) {
    %c0_i32 = arith.constant 0 : i32
    return %arg2, %arg1 : i32, i32
  }
  func.func @transform_2(%arg0: i32, %arg1: i32, %arg2: i32) -> (i32, i32) {
    %c0_i32 = arith.constant 0 : i32
    return %arg0, %arg1 : i32, i32
  }
}

</mosaic_0001>

<bundles_post_ra>
// kernel: linear_forward.1
= control target key start
LH: loop header
LB: loop body
LE: loop exit
PB: predicated region body
PF: predicated region fallthrough
CT: control target
= control target key end

     0   :  { %7 = vsyncpa [#allocation3], 0  ;;  %s204_s9 = smov [#allocation2]   ;;  %s233_s0 = inlined_call_operand.vmem [shape: f32[8,128], index: 0, kind: input, shape index: {}]   ;;  %s234_s1 = inlined_call_operand.hbm [shape: f32[128,128], index: 1, kind: input, shape index: {}]   ;;  %s235_s2 = inlined_call_operand.vmem [shape: f32[8,128], index: 2, kind: output, shape index: {}]  }
   0x1   :  { %s15_s10 = sshll.u32 %s204_s9, 4  ;;  %s16_s10 = int_to_ptr.vmem [resolvable:$true] %s15_s10 }
   0x2   :  { %s190_s11 = scalar_lea.vmem %s16_s10, 2048  ;;  %p195_p1 = scmp.lt.s32.totalorder %s16_s10, %s16_s10 }
   0x3   :  { %p191_p0 = scmp.ne.s32.totalorder %s16_s10, %s190_s11  ;;  %p196_p2 = scmp.lt.s32.totalorder %s190_s11, %s190_s11 }
   0x5   :  { %p197_p3 = por %p196_p2, %p195_p1 }
   0x7   :  { %p198_p4 = pnand %p197_p3, %p191_p0 }
   0x9   :  { %201 = shalt.err (!%p198_p4)
}
   0xa   :  { %s205_s12 = smov 128   ;;  %s206_s13 = smov 8  }
   0xb   :  { %21 = dma.hbm_to_vmem [thread:$0]  %s234_s1, 2048, %s16_s10, [#allocation3], %s205_s12, %s205_s12, %s206_s13  }
   0xc   :  { %202 = dma.done.wait [#allocation3], 2048  }
   0xd   :  { %203 = vsyncadd [#allocation3], 4294965248  ;;  %v207_v0 = vmov 0.0   ;;  %vm208_vm0 = vmmov 0   ;;  %v47_v1 = vld [vmem:[#allocation2 + $0x78] sm:$0xff]  ;;  %v46_v2 = vld [vmem:[#allocation2 + $0x70] sm:$0xff] }
   0xe   :  { %142 = vmatprep.subr.mxu0 %v207_v0  ;;  %174 = vmatprep.mubr.msk.f32.mxu0 %vm208_vm0, %v207_v0  ;;  %v45_v3 = vld [vmem:[#allocation2 + $0x68] sm:$0xff]  ;;  %v44_v4 = vld [vmem:[#allocation2 + $0x60] sm:$0xff]  ;;  %v43_v5 = vld [vmem:[#allocation2 + $0x58] sm:$0xff] }
   0xf   :  { %143 = vmatpush3.msra.mxu0 %v47_v1  ;;  %v42_v6 = vld [vmem:[#allocation2 + $0x50] sm:$0xff]  ;;  %v41_v7 = vld [vmem:[#allocation2 + $0x48] sm:$0xff]  ;;  %v40_v8 = vld [vmem:[#allocation2 + $0x40] sm:$0xff] }
  0x10   :  { %144 = vmatprep.subr.mxu0 %v207_v0  ;;  %v39_v9 = vld [vmem:[#allocation2 + $0x38] sm:$0xff]  ;;  %v38_v10 = vld [vmem:[#allocation2 + $0x30] sm:$0xff]  ;;  %v37_v11 = vld [vmem:[#allocation2 + $0x28] sm:$0xff] }
  0x11   :  { %145 = vmatpush3.msra.mxu0 %v46_v2  ;;  %v36_v12 = vld [vmem:[#allocation2 + $0x20] sm:$0xff]  ;;  %v35_v13 = vld [vmem:[#allocation2 + $0x18] sm:$0xff]  ;;  %v34_v14 = vld [vmem:[#allocation2 + $0x10] sm:$0xff] }
  0x12   :  { %146 = vmatprep.subr.mxu0 %v207_v0  ;;  %v33_v15 = vld [vmem:[#allocation2 + $0x8] sm:$0xff]  ;;  %v32_v16 = vld [vmem:[#allocation2] sm:$0xff] }
  0x13   :  { %147 = vmatpush3.msra.mxu0 %v45_v3  ;;  %v31_v17 = vld [vmem:[%s233_s0] sm:$0xff] }
  0x14   :  { %148 = vmatprep.subr.mxu0 %v207_v0 }
  0x15   :  { %149 = vmatpush3.msra.mxu0 %v44_v4 }
  0x16   :  { %150 = vmatprep.subr.mxu0 %v207_v0 }
  0x17   :  { %151 = vmatpush3.msra.mxu0 %v43_v5 }
  0x18   :  { %152 = vmatprep.subr.mxu0 %v207_v0 }
  0x19   :  { %153 = vmatpush3.msra.mxu0 %v42_v6 }
  0x1a   :  { %154 = vmatprep.subr.mxu0 %v207_v0 }
  0x1b   :  { %155 = vmatpush3.msra.mxu0 %v41_v7 }
  0x1c   :  { %156 = vmatprep.subr.mxu0 %v207_v0 }
  0x1d   :  { %157 = vmatpush3.msra.mxu0 %v40_v8 }
  0x1e   :  { %158 = vmatprep.subr.mxu0 %v207_v0 }
  0x1f   :  { %159 = vmatpush3.msra.mxu0 %v39_v9 }
  0x20   :  { %160 = vmatprep.subr.mxu0 %v207_v0 }
  0x21   :  { %161 = vmatpush3.msra.mxu0 %v38_v10 }
  0x22   :  { %162 = vmatprep.subr.mxu0 %v207_v0 }
  0x23   :  { %163 = vmatpush3.msra.mxu0 %v37_v11 }
  0x24   :  { %164 = vmatprep.subr.mxu0 %v207_v0 }
  0x25   :  { %165 = vmatpush3.msra.mxu0 %v36_v12 }
  0x26   :  { %166 = vmatprep.subr.mxu0 %v207_v0 }
  0x27   :  { %167 = vmatpush3.msra.mxu0 %v35_v13 }
  0x28   :  { %168 = vmatprep.subr.mxu0 %v207_v0 }
  0x29   :  { %169 = vmatpush3.msra.mxu0 %v34_v14 }
  0x2a   :  { %170 = vmatprep.subr.mxu0 %v207_v0 }
  0x2b   :  { %171 = vmatpush3.msra.mxu0 %v33_v15 }
  0x2c   :  { %172 = vmatprep.subr.mxu0 %v207_v0 }
  0x2d   :  { %173 = vmatpush3.msra.mxu0 %v32_v16 }
  0x2e   :  { %175 = vmatmul.mubr.f32.vlgmr.msra.gmra.mxu0 %v31_v17 }
  0xee   :  { %v114_v18 = vpop.f32.mrf.mxu0 }
  0xef   :  { %119 = vst [vmem:[%s235_s2] sm:$0xff] %v114_v18 }
  0xf0   :  { %v176_v19 = vpop.f32.mrf.mxu0 }
  0xf1   :  { %124 = vsyncpa [#allocation3], 1 }

</bundles_post_ra>
